<compile_context>
chip_gen: v7x
topology: tpu7x:2x2x1
jax: 0.10.0
libtpu: 0.0.40
codegen_flags: <defaults>
</compile_context>

<pallas_src>
import functools

import jax
import jax.numpy as jnp
from jax.experimental import pallas as pl
from jax.experimental.pallas import tpu as pltpu


def _conv3x3_relu_kernel(x_ref, w_ref, b_ref, o_ref, *, wp):
    # x_ref: (N, Cin, Lp)     bf16  zero-padded images, flattened (row stride wp)
    # w_ref: (Cout, 9*Cin)    bf16  columns ordered (dh, dw, ci)
    # b_ref: (Cout, 1)        f32
    # o_ref: (N, Cout, H*wp)  f32   "wide" output, lane-dense
    n_batch = x_ref.shape[0]
    hww = o_ref.shape[-1]                     # H * wp

    w2d = w_ref[...]                          # (Cout, 9*Cin) bf16
    b = b_ref[...]                            # (Cout, 1) f32

    for n in range(n_batch):                  # static unroll (N is tiny)
        # im2col: tap (dh, dw) is a contiguous lane slice of the flat image.
        slabs = [
            x_ref[n, :, dh * wp + dw: dh * wp + dw + hww]   # (Cin, hww) bf16
            for dh in range(3) for dw in range(3)
        ]
        patches = jnp.concatenate(slabs, axis=0)            # (9*Cin, hww) bf16
        # Single MXU matmul: M=Cout, K=9*Cin, N=H*wp lanes, f32 accumulation.
        acc = jnp.dot(w2d, patches, preferred_element_type=jnp.float32)
        acc = jnp.maximum(acc + b, 0.0)                     # bias + ReLU (f32)
        o_ref[n] = acc.astype(o_ref.dtype)                  # dense lane-wide store


def conv3x3_relu(x_nchw, weight, bias):
    """x_nchw: (N, Cin, H, W) f32; weight: (Cout, Cin, 3, 3) f32 (PyTorch OIHW);
    bias: (Cout,) f32.  Returns ReLU(conv2d(x, w, b, stride=1, padding=1)),
    shape (N, Cout, H, W)."""
    N, Cin, H, W = x_nchw.shape
    Cout = weight.shape[0]

    wp = W + 2                    # padded row width (1-px halo left/right)
    hww = H * wp                  # "wide" flattened output length per image
    # Pad rows by (1, 2): usual 1-px halo top/bottom plus one extra zero row
    # so the most-shifted tap (dh = dw = 2) never reads past the flat buffer.
    lp = (H + 3) * wp

    # Input glue: one fused pad + bf16 cast; the reshape is free (contiguous).
    x_flat = jnp.pad(x_nchw, ((0, 0), (0, 0), (1, 2), (1, 1)))
    x_flat = x_flat.astype(jnp.bfloat16).reshape(N, Cin, lp)
    # Weight: (Cout, Cin, 3, 3) -> (Cout, 9*Cin), column order (dh, dw, ci).
    w2d = jnp.transpose(weight, (0, 2, 3, 1)).reshape(Cout, 9 * Cin)
    w2d = w2d.astype(jnp.bfloat16)
    b2d = bias.reshape(Cout, 1).astype(jnp.float32)

    kernel = functools.partial(_conv3x3_relu_kernel, wp=wp)

    out_wide = pl.pallas_call(
        kernel,
        out_shape=jax.ShapeDtypeStruct((N, Cout, hww), jnp.float32),
        grid=(1,),                                 # whole problem fits in VMEM
        in_specs=[
            pl.BlockSpec((N, Cin, lp), lambda i: (0, 0, 0)),
            pl.BlockSpec((Cout, 9 * Cin), lambda i: (0, 0)),
            pl.BlockSpec((Cout, 1), lambda i: (0, 0)),
        ],
        out_specs=pl.BlockSpec((N, Cout, hww), lambda i: (0, 0, 0)),
        compiler_params=pltpu.CompilerParams(
            dimension_semantics=("arbitrary",),
        ),
    )(x_flat, w2d, b2d)

    # (N, Cout, H*wp) -> (N, Cout, H, wp) is a free reshape; dropping the two
    # garbage halo columns per row gives the NCHW result -- no transposes.
    out = out_wide.reshape(N, Cout, H, wp)[:, :, :, :W]
    return out.astype(x_nchw.dtype)


if __name__ == "__main__":
    # Small shapes consistent with the module: batch=2, c_in=4, c_out=8, 16x16.
    N, Cin, Cout, H, W = 2, 4, 8, 16, 16

    key = jax.random.PRNGKey(0)
    kx, kw, kb = jax.random.split(key, 3)
    x = jax.random.normal(kx, (N, Cin, H, W), dtype=jnp.float32)
    # Deterministic parameter init (Conv2d-like scale).
    fan_in = Cin * 3 * 3
    bound = 1.0 / (fan_in ** 0.5)
    weight = jax.random.uniform(kw, (Cout, Cin, 3, 3), jnp.float32, -bound, bound)
    bias = jax.random.uniform(kb, (Cout,), jnp.float32, -bound, bound)

    out = conv3x3_relu(x, weight, bias)
    out = jax.block_until_ready(out)
    assert out.shape == (N, Cout, H, W)

    # Reference: same bf16-quantised activations/weights the MXU sees,
    # accumulated in f32 (matches nn.Conv2d + ReLU semantics up to bf16 cast).
    xq = x.astype(jnp.bfloat16).astype(jnp.float32)
    wq = weight.astype(jnp.bfloat16).astype(jnp.float32)
    ref = jax.lax.conv_general_dilated(
        xq, wq, window_strides=(1, 1), padding=((1, 1), (1, 1)),
        dimension_numbers=("NCHW", "OIHW", "NCHW"),
    ) + bias[None, :, None, None]
    ref = jnp.maximum(ref, 0.0)
    assert jnp.allclose(out, ref, atol=2e-2, rtol=2e-2), (
        float(jnp.max(jnp.abs(out - ref))))

    print("KERNEL_OK")
</pallas_src>

<mosaic_0001>
module attributes {stable_mosaic.version = 11 : i64} {
  func.func @_conv3x3_relu_kernel(%arg0: i32, %arg1: memref<2x4x342xbf16, #tpu.memory_space<vmem>>, %arg2: memref<8x36xbf16, #tpu.memory_space<vmem>>, %arg3: memref<8x1xf32, #tpu.memory_space<vmem>>, %arg4: memref<2x8x288xf32, #tpu.memory_space<vmem>>) attributes {dimension_semantics = [#tpu.dimension_semantics<arbitrary>], iteration_bounds = array<i64: 1>, scalar_prefetch = 0 : i64, scratch_operands = 0 : i64, tpu.core_type = #tpu.core_type<tc>, window_params = [{pipeline_mode = #tpu.pipeline_mode<synchronous>, transform_indices = @transform_0, window_bounds = array<i64: 2, 4, 342>}, {pipeline_mode = #tpu.pipeline_mode<synchronous>, transform_indices = @transform_1, window_bounds = array<i64: 8, 36>}, {pipeline_mode = #tpu.pipeline_mode<synchronous>, transform_indices = @transform_2, window_bounds = array<i64: 8, 1>}, {pipeline_mode = #tpu.pipeline_mode<synchronous>, transform_indices = @transform_3, window_bounds = array<i64: 2, 8, 288>}]} {
    %c0 = arith.constant 0 : index
    %c0_0 = arith.constant 0 : index
    %0 = vector.load %arg2[%c0, %c0_0] : memref<8x36xbf16, #tpu.memory_space<vmem>>, vector<8x36xbf16>
    %c0_1 = arith.constant 0 : index
    %c0_2 = arith.constant 0 : index
    %1 = vector.load %arg3[%c0_1, %c0_2] : memref<8x1xf32, #tpu.memory_space<vmem>>, vector<8x1xf32>
    %c0_3 = arith.constant 0 : index
    %c0_4 = arith.constant 0 : index
    %c0_5 = arith.constant 0 : index
    %2 = vector.load %arg1[%c0_3, %c0_4, %c0_5] : memref<2x4x342xbf16, #tpu.memory_space<vmem>>, vector<1x4x288xbf16>
    %3 = vector.shape_cast %2 : vector<1x4x288xbf16> to vector<4x288xbf16>
    %c0_6 = arith.constant 0 : index
    %c0_7 = arith.constant 0 : index
    %c1 = arith.constant 1 : index
    %4 = vector.load %arg1[%c0_6, %c0_7, %c1] : memref<2x4x342xbf16, #tpu.memory_space<vmem>>, vector<1x4x288xbf16>
    %5 = vector.shape_cast %4 : vector<1x4x288xbf16> to vector<4x288xbf16>
    %c0_8 = arith.constant 0 : index
    %c0_9 = arith.constant 0 : index
    %c2 = arith.constant 2 : index
    %6 = vector.load %arg1[%c0_8, %c0_9, %c2] : memref<2x4x342xbf16, #tpu.memory_space<vmem>>, vector<1x4x288xbf16>
    %7 = vector.shape_cast %6 : vector<1x4x288xbf16> to vector<4x288xbf16>
    %c0_10 = arith.constant 0 : index
    %c0_11 = arith.constant 0 : index
    %c18 = arith.constant 18 : index
    %8 = vector.load %arg1[%c0_10, %c0_11, %c18] : memref<2x4x342xbf16, #tpu.memory_space<vmem>>, vector<1x4x288xbf16>
    %9 = vector.shape_cast %8 : vector<1x4x288xbf16> to vector<4x288xbf16>
    %c0_12 = arith.constant 0 : index
    %c0_13 = arith.constant 0 : index
    %c19 = arith.constant 19 : index
    %10 = vector.load %arg1[%c0_12, %c0_13, %c19] : memref<2x4x342xbf16, #tpu.memory_space<vmem>>, vector<1x4x288xbf16>
    %11 = vector.shape_cast %10 : vector<1x4x288xbf16> to vector<4x288xbf16>
    %c0_14 = arith.constant 0 : index
    %c0_15 = arith.constant 0 : index
    %c20 = arith.constant 20 : index
    %12 = vector.load %arg1[%c0_14, %c0_15, %c20] : memref<2x4x342xbf16, #tpu.memory_space<vmem>>, vector<1x4x288xbf16>
    %13 = vector.shape_cast %12 : vector<1x4x288xbf16> to vector<4x288xbf16>
    %c0_16 = arith.constant 0 : index
    %c0_17 = arith.constant 0 : index
    %c36 = arith.constant 36 : index
    %14 = vector.load %arg1[%c0_16, %c0_17, %c36] : memref<2x4x342xbf16, #tpu.memory_space<vmem>>, vector<1x4x288xbf16>
    %15 = vector.shape_cast %14 : vector<1x4x288xbf16> to vector<4x288xbf16>
    %c0_18 = arith.constant 0 : index
    %c0_19 = arith.constant 0 : index
    %c37 = arith.constant 37 : index
    %16 = vector.load %arg1[%c0_18, %c0_19, %c37] : memref<2x4x342xbf16, #tpu.memory_space<vmem>>, vector<1x4x288xbf16>
    %17 = vector.shape_cast %16 : vector<1x4x288xbf16> to vector<4x288xbf16>
    %c0_20 = arith.constant 0 : index
    %c0_21 = arith.constant 0 : index
    %c38 = arith.constant 38 : index
    %18 = vector.load %arg1[%c0_20, %c0_21, %c38] : memref<2x4x342xbf16, #tpu.memory_space<vmem>>, vector<1x4x288xbf16>
    %19 = vector.shape_cast %18 : vector<1x4x288xbf16> to vector<4x288xbf16>
    %20 = tpu.concatenate %3, %5, %7, %9, %11, %13, %15, %17, %19 in 0 : vector<4x288xbf16>, vector<4x288xbf16>, vector<4x288xbf16>, vector<4x288xbf16>, vector<4x288xbf16>, vector<4x288xbf16>, vector<4x288xbf16>, vector<4x288xbf16>, vector<4x288xbf16> -> vector<36x288xbf16>
    %cst = arith.constant dense<0.000000e+00> : vector<8x288xf32>
    %21 = tpu.matmul %0, %20, %cst {dimension_numbers = #tpu.dot_dimension_numbers<[1], [0], [0], [1], [0, 0, 1, 1], [], []>} : vector<8x36xbf16>, vector<36x288xbf16>, vector<8x288xf32> -> vector<8x288xf32>
    %22 = vector.broadcast %1 : vector<8x1xf32> to vector<8x288xf32>
    %23 = arith.addf %21, %22 : vector<8x288xf32>
    %cst_22 = arith.constant 0.000000e+00 : f32
    %24 = vector.broadcast %cst_22 : f32 to vector<8x288xf32>
    %25 = arith.maximumf %23, %24 : vector<8x288xf32>
    %c0_23 = arith.constant 0 : index
    %c0_24 = arith.constant 0 : index
    %c0_25 = arith.constant 0 : index
    %26 = vector.load %arg4[%c0_23, %c0_24, %c0_25] : memref<2x8x288xf32, #tpu.memory_space<vmem>>, vector<1x8x288xf32>
    %27 = vector.shape_cast %26 : vector<1x8x288xf32> to vector<8x288xf32>
    %28 = vector.shape_cast %25 : vector<8x288xf32> to vector<1x8x288xf32>
    tpu.vector_store %arg4[%c0_23, %c0_24, %c0_25], %28 {strides = array<i32>} : memref<2x8x288xf32, #tpu.memory_space<vmem>>, vector<1x8x288xf32>,
    %c1_26 = arith.constant 1 : index
    %c0_27 = arith.constant 0 : index
    %c0_28 = arith.constant 0 : index
    %29 = vector.load %arg1[%c1_26, %c0_27, %c0_28] : memref<2x4x342xbf16, #tpu.memory_space<vmem>>, vector<1x4x288xbf16>
    %30 = vector.shape_cast %29 : vector<1x4x288xbf16> to vector<4x288xbf16>
    %c1_29 = arith.constant 1 : index
    %c0_30 = arith.constant 0 : index
    %c1_31 = arith.constant 1 : index
    %31 = vector.load %arg1[%c1_29, %c0_30, %c1_31] : memref<2x4x342xbf16, #tpu.memory_space<vmem>>, vector<1x4x288xbf16>
    %32 = vector.shape_cast %31 : vector<1x4x288xbf16> to vector<4x288xbf16>
    %c1_32 = arith.constant 1 : index
    %c0_33 = arith.constant 0 : index
    %c2_34 = arith.constant 2 : index
    %33 = vector.load %arg1[%c1_32, %c0_33, %c2_34] : memref<2x4x342xbf16, #tpu.memory_space<vmem>>, vector<1x4x288xbf16>
    %34 = vector.shape_cast %33 : vector<1x4x288xbf16> to vector<4x288xbf16>
    %c1_35 = arith.constant 1 : index
    %c0_36 = arith.constant 0 : index
    %c18_37 = arith.constant 18 : index
    %35 = vector.load %arg1[%c1_35, %c0_36, %c18_37] : memref<2x4x342xbf16, #tpu.memory_space<vmem>>, vector<1x4x288xbf16>
    %36 = vector.shape_cast %35 : vector<1x4x288xbf16> to vector<4x288xbf16>
    %c1_38 = arith.constant 1 : index
    %c0_39 = arith.constant 0 : index
    %c19_40 = arith.constant 19 : index
    %37 = vector.load %arg1[%c1_38, %c0_39, %c19_40] : memref<2x4x342xbf16, #tpu.memory_space<vmem>>, vector<1x4x288xbf16>
    %38 = vector.shape_cast %37 : vector<1x4x288xbf16> to vector<4x288xbf16>
    %c1_41 = arith.constant 1 : index
    %c0_42 = arith.constant 0 : index
    %c20_43 = arith.constant 20 : index
    %39 = vector.load %arg1[%c1_41, %c0_42, %c20_43] : memref<2x4x342xbf16, #tpu.memory_space<vmem>>, vector<1x4x288xbf16>
    %40 = vector.shape_cast %39 : vector<1x4x288xbf16> to vector<4x288xbf16>
    %c1_44 = arith.constant 1 : index
    %c0_45 = arith.constant 0 : index
    %c36_46 = arith.constant 36 : index
    %41 = vector.load %arg1[%c1_44, %c0_45, %c36_46] : memref<2x4x342xbf16, #tpu.memory_space<vmem>>, vector<1x4x288xbf16>
    %42 = vector.shape_cast %41 : vector<1x4x288xbf16> to vector<4x288xbf16>
    %c1_47 = arith.constant 1 : index
    %c0_48 = arith.constant 0 : index
    %c37_49 = arith.constant 37 : index
    %43 = vector.load %arg1[%c1_47, %c0_48, %c37_49] : memref<2x4x342xbf16, #tpu.memory_space<vmem>>, vector<1x4x288xbf16>
    %44 = vector.shape_cast %43 : vector<1x4x288xbf16> to vector<4x288xbf16>
    %c1_50 = arith.constant 1 : index
    %c0_51 = arith.constant 0 : index
    %c38_52 = arith.constant 38 : index
    %45 = vector.load %arg1[%c1_50, %c0_51, %c38_52] : memref<2x4x342xbf16, #tpu.memory_space<vmem>>, vector<1x4x288xbf16>
    %46 = vector.shape_cast %45 : vector<1x4x288xbf16> to vector<4x288xbf16>
    %47 = tpu.concatenate %30, %32, %34, %36, %38, %40, %42, %44, %46 in 0 : vector<4x288xbf16>, vector<4x288xbf16>, vector<4x288xbf16>, vector<4x288xbf16>, vector<4x288xbf16>, vector<4x288xbf16>, vector<4x288xbf16>, vector<4x288xbf16>, vector<4x288xbf16> -> vector<36x288xbf16>
    %cst_53 = arith.constant dense<0.000000e+00> : vector<8x288xf32>
    %48 = tpu.matmul %0, %47, %cst_53 {dimension_numbers = #tpu.dot_dimension_numbers<[1], [0], [0], [1], [0, 0, 1, 1], [], []>} : vector<8x36xbf16>, vector<36x288xbf16>, vector<8x288xf32> -> vector<8x288xf32>
    %49 = vector.broadcast %1 : vector<8x1xf32> to vector<8x288xf32>
    %50 = arith.addf %48, %49 : vector<8x288xf32>
    %cst_54 = arith.constant 0.000000e+00 : f32
    %51 = vector.broadcast %cst_54 : f32 to vector<8x288xf32>
    %52 = arith.maximumf %50, %51 : vector<8x288xf32>
    %c1_55 = arith.constant 1 : index
    %c0_56 = arith.constant 0 : index
    %c0_57 = arith.constant 0 : index
    %53 = vector.load %arg4[%c1_55, %c0_56, %c0_57] : memref<2x8x288xf32, #tpu.memory_space<vmem>>, vector<1x8x288xf32>
    %54 = vector.shape_cast %53 : vector<1x8x288xf32> to vector<8x288xf32>
    %55 = vector.shape_cast %52 : vector<8x288xf32> to vector<1x8x288xf32>
    tpu.vector_store %arg4[%c1_55, %c0_56, %c0_57], %55 {strides = array<i32>} : memref<2x8x288xf32, #tpu.memory_space<vmem>>, vector<1x8x288xf32>,
    return
  }
  func.func @transform_0(%arg0: i32) -> (i32, i32, i32) {
    %c0_i32 = arith.constant 0 : i32
    %c0_i32_0 = arith.constant 0 : i32
    %c0_i32_1 = arith.constant 0 : i32
    %c0_i32_2 = arith.constant 0 : i32
    return %c0_i32, %c0_i32_0, %c0_i32_1 : i32, i32, i32
  }
  func.func @transform_1(%arg0: i32) -> (i32, i32) {
    %c0_i32 = arith.constant 0 : i32
    %c0_i32_0 = arith.constant 0 : i32
    %c0_i32_1 = arith.constant 0 : i32
    return %c0_i32, %c0_i32_0 : i32, i32
  }
  func.func @transform_2(%arg0: i32) -> (i32, i32) {
    %c0_i32 = arith.constant 0 : i32
    %c0_i32_0 = arith.constant 0 : i32
    %c0_i32_1 = arith.constant 0 : i32
    return %c0_i32, %c0_i32_0 : i32, i32
  }
  func.func @transform_3(%arg0: i32) -> (i32, i32, i32) {
    %c0_i32 = arith.constant 0 : i32
    %c0_i32_0 = arith.constant 0 : i32
    %c0_i32_1 = arith.constant 0 : i32
    %c0_i32_2 = arith.constant 0 : i32
    return %c0_i32, %c0_i32_0, %c0_i32_1 : i32, i32, i32
  }
}

</mosaic_0001>

<bundles_post_ra>
// kernel: tpu_custom_call.1
= control target key start
LH: loop header
LB: loop body
LE: loop exit
PB: predicated region body
PF: predicated region fallthrough
CT: control target
= control target key end

     0   :  { %8 = vsyncpa [#allocation3], 0  ;;  %s918_s0 = inlined_call_operand.hbm [shape: bf16[2,4,342], index: 0, kind: input, shape index: {}]   ;;  %s919_s1 = inlined_call_operand.vmem [shape: bf16[8,36], index: 1, kind: input, shape index: {}]   ;;  %s920_s2 = inlined_call_operand.vmem [shape: f32[8,1], index: 2, kind: input, shape index: {}]   ;;  %s921_s3 = inlined_call_operand.hbm [shape: f32[2,8,288], index: 3, kind: output, shape index: {}]  }
   0x1   :  { %9 = vsyncpa [#allocation4], 0  ;;  %s653_s12 = smov [#allocation2]   ;;  %s605_s16 = scalar_lea.hbm %s918_s0, 192 }
   0x2   :  { %s15_s13 = sshll.u32 %s653_s12, 4  ;;  %p606_p0 = scmp.ne.s32.totalorder %s918_s0, %s605_s16  ;;  %s16_s13 = int_to_ptr.vmem [resolvable:$true] %s15_s13 }
   0x3   :  { %p609_p1 = scmp.lt.u32.totalorder %s605_s16, %s918_s0 }
   0x5   :  { %p611_p2 = pnand %p609_p1, %p606_p0 }
   0x7   :  { %614 = shalt.err (!%p611_p2)
}
   0x8   :  { %s615_s21 = scalar_lea.vmem %s16_s13, 192  ;;  %p620_p4 = scmp.lt.s32.totalorder %s16_s13, %s16_s13 }
   0x9   :  { %p616_p3 = scmp.ne.s32.totalorder %s16_s13, %s615_s21  ;;  %p621_p5 = scmp.lt.s32.totalorder %s615_s21, %s615_s21 }
   0xb   :  { %p622_p6 = por %p621_p5, %p620_p4 }
   0xd   :  { %p623_p7 = pnand %p622_p6, %p616_p3 }
   0xf   :  { %626 = shalt.err (!%p623_p7)
}
  0x10   :  { %s654_s22 = smov 96   ;;  %s655_s23 = smov 6  }
  0x11   :  { %21 = dma.hbm_to_vmem [thread:$0]  %s918_s0, 192, %s16_s13, [#allocation3], %s654_s22, %s654_s22, %s655_s23  }
  0x12   :  { %649 = dma.done.wait [#allocation3], 192  }
  0x13   :  { %650 = vsyncadd [#allocation3], 4294967104  ;;  %v38_v0 = vlaneseq  ;;  %v656_v1 = vmov 1983009808   ;;  %v32_v6 = vld [vmem:[#allocation2] sm:$0x3f] }
  0x14   :  { %v36_v2 = vunpack.c.l.s4 %v656_v1  ;;  %v50_v8 = vcombine.low %v32_v6, %v32_v6  ;;  %s657_s26 = smov 126   ;;  %s658_s27 = smov 127   ;;  %v34_v10 = vcombine.high %v32_v6, %v32_v6  ;;  %v659_v11 = vmov 0.0   ;;  %v292_v18 = vld [vmem:[#allocation2 + $0x6] sm:$0x3f] }
  0x15   :  { %v39_v3 = vshrl.u32 %v38_v0, 7  ;;  %562 = vmatprep.subr.bf16.mxu1 %v659_v11  ;;  %s660_s0 = smov 110   ;;  %s661_s28 = smov 109   ;;  %v310_v19 = vcombine.low %v292_v18, %v292_v18  ;;  %v294_v23 = vcombine.high %v292_v18, %v292_v18  ;;  %vm666_vm0 = vmmov 0   ;;  %v31_v30 = vld [vmem:[%s920_s2] sm:$0xff] }
  0x16   :  { %v37_v4 = vunpack.c.0.s8 %v36_v2  ;;  %s662_s29 = smov 108   ;;  %s663_s30 = smov 92   ;;  %568 = vmatprep.mubr.msk.bf16.mxu1 %vm666_vm0, %v659_v11  ;;  %v667_v27 = vmov 0   ;;  %vm65_vm1 = vcmask 1039360   ;;  %vm134_vm2 = vcmask 1041408  }
  0x17   :  { %s664_s4 = smov 91   ;;  %s665_s5 = smov 90   ;;  %235 = vmatprep.mubr.bf16.mxu0 %v667_v27  ;;  %600 = vset.pattern.permute.xlu0 %v667_v27  ;;  %vm86_vm3 = vcmask 900096   ;;  %vm76_vm4 = vcmask 1031168   ;;  %vm151_vm5 = vcmask 1045504   ;;  %vm144_vm6 = vcmask 1043456  }
  0x18   :  { %v40_v5 = vsub.s32 %v37_v4, %v39_v3  ;;  %vm104_vm7 = vcmask 883712   ;;  %vm113_vm8 = vcmask 752640   ;;  %vm95_vm9 = vcmask 891904  }
  0x19   :  { %vm122_vm10 = vcmask 744448   ;;  %vm131_vm11 = vcmask 736256   ;;  %vm190_vm12 = vcmask 293888   ;;  %vm289_vm13 = vcmask 261120  }
  0x1a   :  { %v703_v7 = vrot.slane %v32_v6, %v40_v5  ;;  %v57_v9 = vrot.slane %v50_v8, %v40_v5  ;;  %v714_v14 = vrot.slane %v34_v10, %v40_v5  ;;  %v317_v20 = vrot.slane %v310_v19, %v40_v5 }
  0x1b   :  { %v750_v21 = vrot.slane %v292_v18, %v40_v5  ;;  %v757_v24 = vrot.slane %v294_v23, %v40_v5 }
  0x1c   :  { %72 = vrot.lane.b32.xlu1 %v703_v7, %s657_s26  ;;  %63 = vrot.lane.b32.xlu0 %v703_v7, %s658_s27  ;;  %v58_v12 = vcombine.high %v57_v9, %v57_v9  ;;  %v68_v13 = vcombine.low %v703_v7, %v703_v7  ;;  %v69_v15 = vcombine.low %v714_v14, %v714_v14 }
  0x1d   :  { %v724_v16 = vcombine.high %v703_v7, %v703_v7  ;;  %v79_v17 = vcombine.low %v57_v9, %v57_v9  ;;  %v318_v22 = vcombine.high %v317_v20, %v317_v20  ;;  %v327_v25 = vcombine.low %v750_v21, %v750_v21 }
  0x1e   :  { %v328_v26 = vcombine.low %v757_v24, %v757_v24  ;;  %v774_v28 = vcombine.high %v750_v21, %v750_v21  ;;  %v337_v29 = vcombine.low %v317_v20, %v317_v20 }
  0x20   :  { %59 = vrot.lane.b32.xlu1 %v57_v9, %s658_s27  ;;  %82 = vrot.lane.b32.xlu0 %v57_v9, %s660_s0 }
  0x24   :  { %61 = vrot.lane.b32.xlu0 %v58_v12, %s658_s27  ;;  %70 = vrot.lane.b32.xlu1 %v68_v13, %s657_s26 }
  0x28   :  { %84 = vrot.lane.b32.xlu1 %v68_v13, %s660_s0  ;;  %74 = vrot.lane.b32.xlu0 %v69_v15, %s657_s26 }
  0x2c   :  { %91 = vrot.lane.b32.xlu1 %v724_v16, %s661_s28  ;;  %80 = vrot.lane.b32.xlu0 %v79_v17, %s660_s0 }
  0x30   :  { %100 = vrot.lane.b32.xlu1 %v58_v12, %s662_s29  ;;  %93 = vrot.lane.b32.xlu0 %v714_v14, %s661_s28 }
  0x34   :  { %89 = vrot.lane.b32.xlu1 %v703_v7, %s661_s28  ;;  %102 = vrot.lane.b32.xlu0 %v703_v7, %s662_s29 }
  0x38   :  { %109 = vrot.lane.b32.xlu1 %v703_v7, %s663_s30  ;;  %98 = vrot.lane.b32.xlu0 %v57_v9, %s662_s29 }
  0x3c   :  { %107 = vrot.lane.b32.xlu1 %v68_v13, %s663_s30  ;;  %111 = vrot.lane.b32.xlu0 %v69_v15, %s663_s30 }
  0x40   :  { %120 = vrot.lane.b32.xlu1 %v68_v13, %s664_s4  ;;  %118 = vrot.lane.b32.xlu0 %v57_v9, %s664_s4 }
  0x44   :  { %125 = vrot.lane.b32.xlu1 %v703_v7, %s665_s5  ;;  %116 = vrot.lane.b32.xlu0 %v79_v17, %s664_s4 }
  0x48   :  { %129 = vrot.lane.b32.xlu1 %v714_v14, %s665_s5  ;;  %127 = vrot.lane.b32.xlu0 %v724_v16, %s665_s5 }
  0x4c   :  { %323 = vrot.lane.b32.xlu1 %v750_v21, %s658_s27  ;;  %321 = vrot.lane.b32.xlu0 %v318_v22, %s658_s27 }
  0x50   :  { %331 = vrot.lane.b32.xlu1 %v750_v21, %s657_s26  ;;  %319 = vrot.lane.b32.xlu0 %v317_v20, %s658_s27 }
  0x54   :  { %329 = vrot.lane.b32.xlu1 %v327_v25, %s657_s26  ;;  %333 = vrot.lane.b32.xlu0 %v328_v26, %s657_s26 }
  0x58   :  { %342 = vrot.lane.b32.xlu1 %v327_v25, %s660_s0  ;;  %340 = vrot.lane.b32.xlu0 %v317_v20, %s660_s0 }
  0x5c   :  { %348 = vrot.lane.b32.xlu1 %v774_v28, %s661_s28  ;;  %338 = vrot.lane.b32.xlu0 %v337_v29, %s660_s0 }
  0x60   :  { %356 = vrot.lane.b32.xlu1 %v318_v22, %s662_s29  ;;  %350 = vrot.lane.b32.xlu0 %v757_v24, %s661_s28 }
  0x64   :  { %346 = vrot.lane.b32.xlu1 %v750_v21, %s661_s28  ;;  %358 = vrot.lane.b32.xlu0 %v750_v21, %s662_s29 }
  0x68   :  { %364 = vrot.lane.b32.xlu1 %v750_v21, %s663_s30  ;;  %354 = vrot.lane.b32.xlu0 %v317_v20, %s662_s29 }
  0x6c   :  { %362 = vrot.lane.b32.xlu1 %v327_v25, %s663_s30  ;;  %366 = vrot.lane.b32.xlu0 %v328_v26, %s663_s30 }
  0x70   :  { %374 = vrot.lane.b32.xlu1 %v327_v25, %s664_s4  ;;  %372 = vrot.lane.b32.xlu0 %v317_v20, %s664_s4 }
  0x74   :  { %378 = vrot.lane.b32.xlu1 %v750_v21, %s665_s5  ;;  %370 = vrot.lane.b32.xlu0 %v337_v29, %s664_s4 }
  0x78   :  { %382 = vrot.lane.b32.xlu1 %v757_v24, %s665_s5  ;;  %380 = vrot.lane.b32.xlu0 %v774_v28, %s665_s5 }
  0x7c   :  { %187 = vperm.xlu0 %600, %v31_v30  }
  0x8e   :  { %v73_v31 = vpop.permute.xlu1 %72  ;;  %v64_v32 = vpop.permute.xlu0 %63 }
  0x8f   :  { %v143_v39 = vsel %vm134_vm2, %v714_v14, %v64_v32 }
  0x92   :  { %v60_v33 = vpop.permute.xlu1 %59  ;;  %v83_v34 = vpop.permute.xlu0 %82 }
  0x96   :  { %v62_v35 = vpop.permute.xlu0 %61  ;;  %v71_v36 = vpop.permute.xlu1 %70 }
  0x97   :  { %v67_v37 = vsel %vm65_vm1, %v62_v35, %v64_v32  ;;  %v66_v38 = vsel %vm65_vm1, %v60_v33, %v62_v35  ;;  %v77_v47 = vsel %vm76_vm4, %v71_v36, %v73_v31  ;;  %v848_v32 = vld [vmem:[%s919_s1] sm:$0xf]  ;;  %s668_s1 = smov [#allocation5]  }
  0x98   :  { %v140_v42 = vsel %vm134_vm2, %v724_v16, %v67_v37  ;;  %v137_v46 = vsel %vm134_vm2, %v703_v7, %v66_v38  ;;  %s536_s9 = sshll.u32 %s668_s1, 4  ;;  %s537_s9 = int_to_ptr.vmem [resolvable:$true] %s536_s9 }
  0x99   :  { %v146_v54 = vsel %vm144_vm6, %v137_v46, %v77_v47  ;;  %s627_s10 = scalar_lea.vmem %s537_s9, 768  ;;  %p632_p9 = scmp.lt.s32.totalorder %s537_s9, %s537_s9 }
  0x9a   :  { %v85_v40 = vpop.permute.xlu1 %84  ;;  %v75_v41 = vpop.permute.xlu0 %74  ;;  %p628_p8 = scmp.ne.s32.totalorder %s537_s9, %s627_s10  ;;  %p633_p10 = scmp.lt.s32.totalorder %s627_s10, %s627_s10 }
  0x9b   :  { %v88_v43 = vsel %vm86_vm3, %v83_v34, %v85_v40  ;;  %v78_v44 = vsel %vm76_vm4, %v73_v31, %v75_v41  ;;  %v150_v45 = vsel %vm144_vm6, %v143_v39, %v75_v41 }
  0x9c   :  { %v159_v48 = vsel %vm151_vm5, %v150_v45, %v85_v40  ;;  %v148_v49 = vsel %vm144_vm6, %v140_v42, %v78_v44  ;;  %p634_p11 = por %p633_p10, %p632_p9 }
  0x9d   :  { %563 = vmatpush3.bf16.msra.mxu1 %v159_v48  ;;  %v156_v50 = vsel %vm151_vm5, %v148_v49, %v88_v43 }
  0x9e   :  { %v92_v51 = vpop.permute.xlu1 %91  ;;  %203 = vmatprep.subr.bf16.mxu0 %v156_v50  ;;  %v81_v52 = vpop.permute.xlu0 %80  ;;  %564 = vmatprep.subr.bf16.mxu1 %v659_v11  ;;  %p635_p12 = pnand %p634_p11, %p628_p8 }
  0x9f   :  { %v87_v53 = vsel %vm86_vm3, %v81_v52, %v83_v34 }
  0xa0   :  { %v153_v55 = vsel %vm151_vm5, %v146_v54, %v87_v53 }
  0xa1   :  { %204 = vmatpush1.bf16.msra.mxu0 %v153_v55 }
  0xa2   :  { %v101_v56 = vpop.permute.xlu1 %100  ;;  %v94_v57 = vpop.permute.xlu0 %93 }
  0xa3   :  { %v97_v2 = vsel %vm95_vm9, %v92_v51, %v94_v57 }
  0xa6   :  { %v90_v58 = vpop.permute.xlu1 %89  ;;  %v103_v59 = vpop.permute.xlu0 %102 }
  0xa7   :  { %v106_v0 = vsel %vm104_vm7, %v101_v56, %v103_v59  ;;  %v169_v3 = vsel %vm134_vm2, %v94_v57, %v103_v59  ;;  %v96_v15 = vsel %vm95_vm9, %v90_v58, %v92_v51 }
  0xa8   :  { %v166_v4 = vsel %vm134_vm2, %v97_v2, %v106_v0 }
  0xaa   :  { %v110_v60 = vpop.permute.xlu1 %109  ;;  %v99_v61 = vpop.permute.xlu0 %98 }
  0xab   :  { %v105_v8 = vsel %vm104_vm7, %v99_v61, %v101_v56 }
  0xac   :  { %v163_v16 = vsel %vm134_vm2, %v96_v15, %v105_v8 }
  0xae   :  { %v108_v62 = vpop.permute.xlu1 %107  ;;  %v112_v63 = vpop.permute.xlu0 %111 }
  0xaf   :  { %v115_v1 = vsel %vm113_vm8, %v110_v60, %v112_v63  ;;  %v175_v5 = vsel %vm144_vm6, %v169_v3, %v112_v63  ;;  %v114_v13 = vsel %vm113_vm8, %v108_v62, %v110_v60 }
  0xb0   :  { %v173_v12 = vsel %vm144_vm6, %v166_v4, %v115_v1  ;;  %v171_v20 = vsel %vm144_vm6, %v163_v16, %v114_v13 }
  0xb2   :  { %v121_v6 = vpop.permute.xlu1 %120  ;;  %v119_v7 = vpop.permute.xlu0 %118 }
  0xb3   :  { %v124_v9 = vsel %vm122_vm10, %v119_v7, %v121_v6  ;;  %v183_v10 = vsel %vm151_vm5, %v175_v5, %v121_v6 }
  0xb4   :  { %565 = vmatpush3.bf16.msra.mxu1 %v183_v10  ;;  %v180_v14 = vsel %vm151_vm5, %v173_v12, %v124_v9 }
  0xb5   :  { %205 = vmatprep.subr.bf16.mxu0 %v180_v14  ;;  %566 = vmatprep.subr.bf16.mxu1 %v659_v11 }
  0xb6   :  { %v126_v17 = vpop.permute.xlu1 %125  ;;  %v117_v18 = vpop.permute.xlu0 %116 }
  0xb7   :  { %v123_v19 = vsel %vm122_vm10, %v117_v18, %v119_v7 }
  0xb8   :  { %v177_v22 = vsel %vm151_vm5, %v171_v20, %v123_v19 }
  0xb9   :  { %206 = vmatpush1.bf16.msra.mxu0 %v177_v22 }
  0xba   :  { %v130_v23 = vpop.permute.xlu1 %129  ;;  %v128_v25 = vpop.permute.xlu0 %127 }
  0xbb   :  { %v132_v26 = vsel %vm131_vm11, %v126_v17, %v128_v25  ;;  %v133_v29 = vsel %vm131_vm11, %v128_v25, %v130_v23  ;;  %v201_v30 = vsel %vm134_vm2, %v130_v23, 0 }
  0xbc   :  { %548 = vmatprep.subr.msk.bf16.mxu0 %vm134_vm2, %v133_v29  ;;  %567 = vmatpush3.bf16.msra.mxu1 %v201_v30  ;;  %v195_v31 = vsel %vm134_vm2, %v132_v26, 0 }
  0xbd   :  { %208 = vmatpush1.bf16.msra.mxu0 %v195_v31  ;;  %572 = vmatprep.subr.bf16.mxu1 %v659_v11 }
  0xbe   :  { %v324_v33 = vpop.permute.xlu1 %323  ;;  %v322_v34 = vpop.permute.xlu0 %321 }
  0xbf   :  { %569 = vmatmul.mubr.msk.bf16.vlgmr.msra.gmra.mrb[0].mxu1 %vm190_vm12, %v848_v32  ;;  %v326_v39 = vsel %vm65_vm1, %v322_v34, %v324_v33  ;;  %v394_v41 = vsel %vm134_vm2, %v757_v24, %v324_v33 }
  0xc0   :  { %549 = vmatmul.mubr.msk.bf16.vlgmr.msra.gmra.mrb[0].mxu0 %vm190_vm12, %v848_v32  ;;  %578 = vmatprep.mubr.msk.bf16.mxu1 %vm666_vm0, %v659_v11  ;;  %v391_v42 = vsel %vm134_vm2, %v774_v28, %v326_v39 }
  0xc1   :  { %475 = vmatprep.mubr.bf16.mxu0 %v667_v27 }
  0xc2   :  { %v332_v35 = vpop.permute.xlu1 %331  ;;  %v320_v36 = vpop.permute.xlu0 %319 }
  0xc3   :  { %v325_v27 = vsel %vm65_vm1, %v320_v36, %v322_v34 }
  0xc4   :  { %v388_v28 = vsel %vm134_vm2, %v750_v21, %v325_v27 }
  0xc6   :  { %v330_v37 = vpop.permute.xlu1 %329  ;;  %v334_v38 = vpop.permute.xlu0 %333 }
  0xc7   :  { %v336_v40 = vsel %vm76_vm4, %v332_v35, %v334_v38  ;;  %v400_v43 = vsel %vm144_vm6, %v394_v41, %v334_v38  ;;  %v335_v49 = vsel %vm76_vm4, %v330_v37, %v332_v35 }
  0xc8   :  { %v398_v48 = vsel %vm144_vm6, %v391_v42, %v336_v40  ;;  %v396_v52 = vsel %vm144_vm6, %v388_v28, %v335_v49 }
  0xca   :  { %v343_v44 = vpop.permute.xlu1 %342  ;;  %v341_v45 = vpop.permute.xlu0 %340 }
  0xcb   :  { %v408_v46 = vsel %vm151_vm5, %v400_v43, %v343_v44  ;;  %v345_v47 = vsel %vm86_vm3, %v341_v45, %v343_v44 }
  0xcc   :  { %573 = vmatpush3.bf16.msra.mxu1 %v408_v46  ;;  %v405_v24 = vsel %vm151_vm5, %v398_v48, %v345_v47 }
  0xcd   :  { %443 = vmatprep.subr.bf16.mxu0 %v405_v24  ;;  %574 = vmatprep.subr.bf16.mxu1 %v659_v11 }
  0xce   :  { %v349_v50 = vpop.permute.xlu1 %348  ;;  %v339_v51 = vpop.permute.xlu0 %338 }
  0xcf   :  { %v344_v53 = vsel %vm86_vm3, %v339_v51, %v341_v45 }
  0xd0   :  { %v402_v54 = vsel %vm151_vm5, %v396_v52, %v344_v53 }
  0xd1   :  { %444 = vmatpush1.bf16.msra.mxu0 %v402_v54 }
  0xd2   :  { %v357_v55 = vpop.permute.xlu1 %356  ;;  %v351_v56 = vpop.permute.xlu0 %350 }
  0xd3   :  { %v353_v0 = vsel %vm95_vm9, %v349_v50, %v351_v56 }
  0xd6   :  { %v347_v57 = vpop.permute.xlu1 %346  ;;  %v359_v58 = vpop.permute.xlu0 %358 }
  0xd7   :  { %v361_v63 = vsel %vm104_vm7, %v357_v55, %v359_v58  ;;  %v418_v1 = vsel %vm134_vm2, %v351_v56, %v359_v58  ;;  %v352_v13 = vsel %vm95_vm9, %v347_v57, %v349_v50 }
  0xd8   :  { %v415_v2 = vsel %vm134_vm2, %v353_v0, %v361_v63 }
  0xda   :  { %v365_v59 = vpop.permute.xlu1 %364  ;;  %v355_v60 = vpop.permute.xlu0 %354 }
  0xdb   :  { %v360_v6 = vsel %vm104_vm7, %v355_v60, %v357_v55 }
  0xdc   :  { %v412_v14 = vsel %vm134_vm2, %v352_v13, %v360_v6 }
  0xde   :  { %v363_v61 = vpop.permute.xlu1 %362  ;;  %v367_v62 = vpop.permute.xlu0 %366 }
  0xdf   :  { %v369_v21 = vsel %vm113_vm8, %v365_v59, %v367_v62  ;;  %v424_v3 = vsel %vm144_vm6, %v418_v1, %v367_v62  ;;  %v368_v10 = vsel %vm113_vm8, %v363_v61, %v365_v59 }
  0xe0   :  { %v422_v9 = vsel %vm144_vm6, %v415_v2, %v369_v21  ;;  %v420_v17 = vsel %vm144_vm6, %v412_v14, %v368_v10 }
  0xe2   :  { %v375_v4 = vpop.permute.xlu1 %374  ;;  %v373_v5 = vpop.permute.xlu0 %372 }
  0xe3   :  { %v432_v7 = vsel %vm151_vm5, %v424_v3, %v375_v4  ;;  %v377_v8 = vsel %vm122_vm10, %v373_v5, %v375_v4 }
  0xe4   :  { %575 = vmatpush3.bf16.msra.mxu1 %v432_v7  ;;  %v429_v12 = vsel %vm151_vm5, %v422_v9, %v377_v8 }
  0xe5   :  { %445 = vmatprep.subr.bf16.mxu0 %v429_v12  ;;  %576 = vmatprep.subr.bf16.mxu1 %v659_v11 }
  0xe6   :  { %v379_v15 = vpop.permute.xlu1 %378  ;;  %v371_v16 = vpop.permute.xlu0 %370 }
  0xe7   :  { %v376_v18 = vsel %vm122_vm10, %v371_v16, %v373_v5 }
  0xe8   :  { %v426_v19 = vsel %vm151_vm5, %v420_v17, %v376_v18 }
  0xe9   :  { %446 = vmatpush1.bf16.msra.mxu0 %v426_v19 }
  0xea   :  { %v383_v20 = vpop.permute.xlu1 %382  ;;  %v381_v22 = vpop.permute.xlu0 %380 }
  0xeb   :  { %v441_v23 = vsel %vm134_vm2, %v383_v20, 0  ;;  %v384_v25 = vsel %vm131_vm11, %v379_v15, %v381_v22  ;;  %v385_v26 = vsel %vm131_vm11, %v381_v22, %v383_v20 }
  0xec   :  { %v435_v11 = vsel %vm134_vm2, %v384_v25, 0  ;;  %551 = vmatprep.subr.msk.bf16.mxu0 %vm134_vm2, %v385_v26  ;;  %577 = vmatpush3.bf16.msra.mxu1 %v441_v23 }
  0xed   :  { %448 = vmatpush1.bf16.msra.mxu0 %v435_v11 }
  0xef   :  { %579 = vmatmul.mubr.msk.bf16.vlgmr.msra.gmra.mrb[4].mxu1 %vm190_vm12, %v848_v32 }
  0xf0   :  { %552 = vmatmul.mubr.msk.bf16.vlgmr.msra.gmra.mrb[4].mxu0 %vm190_vm12, %v848_v32 }
  0xfb   :  { %v188_v29 = vpop.permute.xlu0 %187 }
 0x192   :  { %v278_v30 = vpop.f32.mrb[0].mxu1 }
 0x193   :  { %v237_v31 = vpop.f32.mrb[0].mxu0  ;;  %v570_v33 = vpop.f32.mrb[1].mxu1  ;;  %v279_v34 = vadd.f32 %v278_v30, %v188_v29 }
 0x194   :  { %v239_v35 = vpop.f32.mrb[1].mxu0  ;;  %v238_v36 = vadd.f32 %v237_v31, %v188_v29  ;;  %v281_v37 = vpop.f32.mrb[2].mxu1 }
 0x195   :  { %v241_v38 = vpop.f32.mrb[2].mxu0  ;;  %v240_v39 = vadd.f32 %v239_v35, %v188_v29  ;;  %v286_v40 = vmax.f32 %v279_v34, 0.0  ;;  %v571_v41 = vpop.f32.mrb[3].mxu1 }
 0x196   :  { %v284_v42 = vmax.f32 %v238_v36, 0.0  ;;  %v242_v43 = vpop.f32.mrb[3].mxu0 }
 0x197   :  { %v285_v44 = vmax.f32 %v240_v39, 0.0  ;;  %290 = vst.msk [vmem:[#allocation5 + $0x10] sm:$0xff] %vm289_vm13, %v286_v40 }
 0x198   :  { %287 = vst [vmem:[#allocation5] sm:$0xff] %v284_v42 }
 0x199   :  { %288 = vst [vmem:[#allocation5 + $0x8] sm:$0xff] %v285_v44 }
 0x1c2   :  { %v518_v32 = vpop.f32.mrb[4].mxu1 }
 0x1c3   :  { %v519_v45 = vadd.f32 %v518_v32, %v188_v29  ;;  %v477_v27 = vpop.f32.mrb[4].mxu0  ;;  %v580_v46 = vpop.f32.mrb[5].mxu1 }
 0x1c4   :  { %v478_v47 = vadd.f32 %v477_v27, %v188_v29  ;;  %v479_v48 = vpop.f32.mrb[5].mxu0  ;;  %v521_v49 = vpop.f32.mrb[6].mxu1 }
 0x1c5   :  { %v526_v24 = vmax.f32 %v519_v45, 0.0  ;;  %v480_v28 = vadd.f32 %v479_v48, %v188_v29  ;;  %v481_v50 = vpop.f32.mrb[6].mxu0  ;;  %v581_v51 = vpop.f32.mrb[7].mxu1 }
 0x1c6   :  { %v524_v52 = vmax.f32 %v478_v47, 0.0  ;;  %v482_v53 = vpop.f32.mrb[7].mxu0 }
 0x1c7   :  { %530 = vst.msk [vmem:[#allocation5 + $0x28] sm:$0xff] %vm289_vm13, %v526_v24  ;;  %v525_v54 = vmax.f32 %v480_v28, 0.0 }
 0x1c8   :  { %528 = vst [vmem:[#allocation5 + $0x18] sm:$0xff] %v524_v52 }
 0x1c9   :  { %529 = vst [vmem:[#allocation5 + $0x20] sm:$0xff] %v525_v54 }
 0x1ca   :  { %638 = shalt.err (!%p635_p12)
}
 0x1cb   :  { %s639_s13 = scalar_lea.hbm %s921_s3, 768 }
 0x1cc   :  { %p640_p13 = scmp.ne.s32.totalorder %s921_s3, %s639_s13  ;;  %p643_p0 = scmp.lt.u32.totalorder %s639_s13, %s921_s3 }
 0x1ce   :  { %p645_p1 = pnand %p643_p0, %p640_p13 }
 0x1d0   :  { %648 = shalt.err (!%p645_p1)
}
 0x1d1   :  { %s669_s18 = smov 384   ;;  %s670_s19 = smov 24  }
 0x1d2   :  { %542 = dma.vmem_to_hbm [thread:$0]  %s537_s9, 768, %s921_s3, [#allocation4], %s669_s18, %s669_s18, %s670_s19  }
 0x1d3   :  { %651 = dma.done.wait [#allocation4], 768  }
 0x1d4   :  { %652 = vsyncadd [#allocation4], 4294966528 }
 0x1d5   :  { %546 = vsyncpa [#allocation3], 1 }
 0x1d6   :  { %547 = vsyncpa [#allocation4], 1 }

</bundles_post_ra>
